<compile_context>
chip_gen: v7x
topology: tpu7x:2x2x1
jax: 0.10.0
libtpu: 0.0.40
codegen_flags: <defaults>
</compile_context>

<pallas_src>
import jax
import jax.numpy as jnp
from jax.experimental import pallas as pl
from jax.experimental.pallas import tpu as pltpu

LANE = 128


def _round_up(x, m):
    return ((x + m - 1) // m) * m


def _vmem_capacity_bytes():
    try:
        return int(pltpu.get_tpu_info().vmem_capacity_bytes)
    except Exception:
        return 64 * 1024 * 1024   # conservative: v7x per-TensorCore VMEM


def _default_num_splits():
    # v7x has 2 TensorCores per chip; v5e/v6e have 1.
    try:
        kind = jax.devices()[0].device_kind.lower()
        if "v7" in kind:
            return 2
    except Exception:
        pass
    return 1


def _pick_tile(d_model, lp, batch, w_itemsize, x_itemsize, budget_bytes,
               tile_cap):
    """Largest d_model tile (multiple of 128 that divides d_model) whose
    double-buffered working set fits the VMEM budget."""
    if d_model % LANE != 0:
        # TODO(synk): pad d_model to a lane multiple instead of loading W1
        # in one piece for non-aligned d_model.
        return d_model
    fixed = (2 * batch * d_model * x_itemsize   # EOS slab (double-buffered)
             + 2 * batch * lp * 4               # output block (f32)
             + 2 * lp * w_itemsize)             # b2
    per_tn = 2 * (d_model + lp + 1) * w_itemsize   # W1 col + W2 row + b1 tiles
    avail = max(budget_bytes - fixed, per_tn * LANE)
    tn = min(tile_cap, d_model, avail // per_tn)
    tn = max(LANE, (tn // LANE) * LANE)
    while tn > LANE and d_model % tn != 0:
        tn -= LANE
    return tn if d_model % tn == 0 else d_model


def _pooler_kernel(eos_ref, x_ref, w1_ref, b1_ref, w2_ref, b2_ref, o_ref):
    # eos_ref is only consumed by the index_maps (fused EOS-row gather).
    del eos_ref
    split = pl.program_id(0)          # TensorCore split (v7x)
    n = pl.program_id(2)              # d_model tile within this split

    @pl.when(n == 0)
    def _init():
        o_ref[...] = jnp.zeros_like(o_ref)

    x = x_ref[0]                                               # [B, D]
    # dense slab: [B, D] @ [D, tn] + [1, tn], f32 accumulation on the MXU.
    h = jnp.dot(x, w1_ref[...], preferred_element_type=jnp.float32)
    h = jnp.tanh(h + b1_ref[...].astype(jnp.float32))
    # dropout: identity at inference time.
    # TODO(synk): training-mode dropout (pltpu.prng_*) not implemented.
    # classifier partial sum: [B, tn] @ [tn, Lp], accumulated in resident f32
    # output block.  (h is rounded to the weight dtype for the MXU matmul.)
    h = h.astype(w2_ref.dtype)
    o_ref[0] += jnp.dot(h, w2_ref[...],
                        preferred_element_type=jnp.float32).astype(o_ref.dtype)

    @pl.when(jnp.logical_and(n == pl.num_programs(2) - 1, split == 0))
    def _finalize():
        # b2 is added exactly once (split 0 only); other splits stay partial
        # sums and are reduced in the wrapper.
        o_ref[0] += b2_ref[...].astype(o_ref.dtype)


def _pooler_pallas(hs, eos, w1, b1, w2, b2, *, tile_n=None, num_splits=None,
                   out_dtype=jnp.float32):
    """hs: [S, B, D], eos: int32[G] -> logits out_dtype [G, B, num_labels]."""
    S, B, D = hs.shape
    G = int(eos.shape[0])
    L = w2.shape[1]
    assert w1.shape == (D, D) and b1.shape == (1, D)
    assert w2.shape[0] == D and b2.shape == (1, L)

    # Lane-dense classifier: pad num_labels up to a multiple of 128.
    Lp = max(LANE, _round_up(L, LANE))
    if Lp != L:
        w2 = jnp.pad(w2, ((0, 0), (0, Lp - L)))
        b2 = jnp.pad(b2, ((0, 0), (0, Lp - L)))

    w_itemsize = jnp.dtype(w1.dtype).itemsize
    x_itemsize = jnp.dtype(hs.dtype).itemsize

    # Generation-aware tile sizing: budget ~half the physical VMEM so the
    # double-buffered working set always fits.
    vmem_cap = _vmem_capacity_bytes()
    budget = max(8 << 20, vmem_cap // 2)
    tn = _pick_tile(D, Lp, B, w_itemsize, x_itemsize, budget,
                    2048 if tile_n is None else int(tile_n))
    tiles = D // tn

    if num_splits is None:
        num_splits = _default_num_splits()
    if num_splits < 1 or tiles % num_splits != 0:
        num_splits = 1
    tps = tiles // num_splits                      # tiles per TC split

    # Explicit scoped-VMEM limit: the (D, tn) W1 block scales with D, so the
    # default scoped limit (16 MiB on v5e) is easily exceeded for large D.
    need = (2 * D * tn * w_itemsize          # W1 col tile, double-buffered
            + 2 * tn * Lp * w_itemsize       # W2 row tile
            + 2 * tn * w_itemsize            # b1 tile
            + 2 * Lp * w_itemsize            # b2
            + 2 * B * D * x_itemsize         # EOS slab
            + 2 * B * Lp * 4)                # output block (f32)
    vmem_limit = int(max(need + (1 << 20),
                         min(vmem_cap,
                             max(int(need * 1.5) + (2 << 20), 16 << 20))))

    nbytes = lambda a: a.size * jnp.dtype(a.dtype).itemsize
    cost = pl.CostEstimate(
        flops=G * (2 * B * D * D + 2 * B * D * Lp),
        transcendentals=G * B * D,
        bytes_accessed=(G * (nbytes(w1) + nbytes(w2) + nbytes(b1) + nbytes(b2))
                        + G * B * D * x_itemsize
                        + num_splits * G * B * Lp * 4),
    )

    out = pl.pallas_call(
        _pooler_kernel,
        out_shape=jax.ShapeDtypeStruct((num_splits * G, B, Lp), out_dtype),
        grid_spec=pltpu.PrefetchScalarGridSpec(
            num_scalar_prefetch=1,
            grid=(num_splits, G, tps),
            in_specs=[
                # EOS row of hidden_states, gathered via the prefetched index;
                # block index depends only on g -> resident across the tile
                # reduction (DMA'd once per EOS entry).
                pl.BlockSpec((1, B, D), lambda s, g, n, eos: (eos[g], 0, 0)),
                pl.BlockSpec((D, tn), lambda s, g, n, eos: (0, s * tps + n)),
                pl.BlockSpec((1, tn), lambda s, g, n, eos: (0, s * tps + n)),
                pl.BlockSpec((tn, Lp), lambda s, g, n, eos: (s * tps + n, 0)),
                pl.BlockSpec((1, Lp), lambda s, g, n, eos: (0, 0)),
            ],
            out_specs=pl.BlockSpec((1, B, Lp),
                                   lambda s, g, n, eos: (s * G + g, 0, 0)),
        ),
        compiler_params=pltpu.CompilerParams(
            dimension_semantics=("parallel", "parallel", "arbitrary"),
            vmem_limit_bytes=vmem_limit),
        cost_estimate=cost,
    )(eos, hs, w1, b1, w2, b2)

    out = out.reshape(num_splits, G, B, Lp)
    out = out.sum(axis=0) if num_splits > 1 else out[0]       # [G, B, Lp]
    return out[..., :L]


def pooler_forward(hidden_states, params, eos_position_indices=-1, *,
                   tile_n=None, num_splits=None):
    """hidden_states: [seq, batch, d_model] -> logits (float32).

    Scalar eos_position_indices (torch default -1): returns [batch, num_labels].
    Array-valued eos_position_indices of shape idx_shape: returns
    [*idx_shape, batch, num_labels] (torch fancy indexing on dim 0); the
    gather is fused in-kernel via scalar prefetch + a grid axis over entries.
    """
    S, B, D = hidden_states.shape
    w1, b1, w2, b2 = params["w1"], params["b1"], params["w2"], params["b2"]

    if isinstance(eos_position_indices, int):
        eos = jnp.array([eos_position_indices % S], jnp.int32)
        lead_shape = None
    else:
        idx = jnp.asarray(eos_position_indices, jnp.int32)
        lead_shape = idx.shape
        eos = (idx.reshape(-1) % S).astype(jnp.int32)   # handle negatives
        # NOTE: weights are streamed once per index entry; for very large
        # index arrays a single-pass batched variant would be preferable.

    logits = _pooler_pallas(hidden_states, eos, w1, b1, w2, b2,
                            tile_n=tile_n, num_splits=num_splits)  # [G, B, L]
    if lead_shape is None:
        return logits[0]
    return logits.reshape(*lead_shape, B, logits.shape[-1])


def init_params(key, d_model, num_labels, dtype=jnp.bfloat16):
    """Weights default to bf16: the kernel is HBM-read bound on W1, so weight
    bytes ~= wall clock; the kernel accumulates in f32 regardless of dtype."""
    k1, k2, k3, k4 = jax.random.split(key, 4)
    scale = 1.0 / jnp.sqrt(d_model)
    return {
        "w1": (jax.random.normal(k1, (d_model, d_model), jnp.float32)
               * scale).astype(dtype),
        "b1": (jax.random.normal(k2, (1, d_model), jnp.float32)
               * 0.02).astype(dtype),
        "w2": (jax.random.normal(k3, (d_model, num_labels), jnp.float32)
               * scale).astype(dtype),
        "b2": (jax.random.normal(k4, (1, num_labels), jnp.float32)
               * 0.02).astype(dtype),
    }


def pooler_reference(hidden_states, params, eos_position_indices=-1):
    """Pure-JAX reference (f32 compute) for correctness checks."""
    if isinstance(eos_position_indices, int):
        last = hidden_states[eos_position_indices]
    else:
        last = jnp.take(hidden_states, jnp.asarray(eos_position_indices),
                        axis=0)
    last = last.astype(jnp.float32)
    h = jnp.tanh(last @ params["w1"].astype(jnp.float32)
                 + params["b1"][0].astype(jnp.float32))
    return (h @ params["w2"].astype(jnp.float32)
            + params["b2"][0].astype(jnp.float32))


if __name__ == "__main__":
    seq, batch, d_model, num_labels = 8, 4, 256, 8

    key = jax.random.PRNGKey(0)
    k_h, k_p = jax.random.split(key)
    hidden_states = jax.random.normal(k_h, (seq, batch, d_model), jnp.float32)
    params_f32 = init_params(k_p, d_model, num_labels, dtype=jnp.float32)

    # 1) f32 path, auto tile / auto TC splits, fused EOS gather (default -1).
    logits = jax.block_until_ready(
        pooler_forward(hidden_states, params_f32, eos_position_indices=-1))
    ref = pooler_reference(hidden_states, params_f32, eos_position_indices=-1)
    assert logits.shape == (batch, num_labels), logits.shape
    assert jnp.allclose(logits, ref, atol=1e-4, rtol=1e-4), (
        float(jnp.max(jnp.abs(logits - ref))))

    # 2) forced d_model tiling + 2-way TensorCore split (exercises the v7x
    #    partial-sum path; runs as a sequential loop on single-TC chips).
    logits_split = jax.block_until_ready(
        pooler_forward(hidden_states, params_f32, eos_position_indices=-1,
                       tile_n=128, num_splits=2))
    assert jnp.allclose(logits_split, ref, atol=1e-4, rtol=1e-4), (
        float(jnp.max(jnp.abs(logits_split - ref))))

    # 3) array-valued eos_position_indices: gather fused via a grid axis over
    #    entries (no XLA gather, no [G, B, D] HBM materialization).
    idx = jnp.array([1, seq - 1], jnp.int32)
    logits_idx = jax.block_until_ready(
        pooler_forward(hidden_states, params_f32, eos_position_indices=idx,
                       tile_n=128))
    ref_idx = pooler_reference(hidden_states, params_f32,
                               eos_position_indices=idx)
    assert logits_idx.shape == (2, batch, num_labels), logits_idx.shape
    assert jnp.allclose(logits_idx, ref_idx, atol=1e-4, rtol=1e-4), (
        float(jnp.max(jnp.abs(logits_idx - ref_idx))))

    # 4) bf16 weights + activations (default init_params dtype; halves the
    #    dominant HBM weight traffic), f32 accumulation in the kernel.
    hs_bf16 = hidden_states.astype(jnp.bfloat16)
    params_bf16 = init_params(k_p, d_model, num_labels)   # bf16 by default
    logits_bf16 = jax.block_until_ready(
        pooler_forward(hs_bf16, params_bf16, eos_position_indices=-1))
    ref_bf16 = pooler_reference(hs_bf16, params_bf16, eos_position_indices=-1)
    assert logits_bf16.dtype == jnp.float32
    assert jnp.allclose(logits_bf16, ref_bf16, atol=3e-2, rtol=3e-2), (
        float(jnp.max(jnp.abs(logits_bf16 - ref_bf16))))

    print("KERNEL_OK")
</pallas_src>

<mosaic_0001>
module attributes {stable_mosaic.version = 11 : i64} {
  func.func @_pooler_kernel(%arg0: i32, %arg1: i32, %arg2: i32, %arg3: memref<1xi32, #tpu.memory_space<smem>>, %arg4: memref<1x4x256xf32, #tpu.memory_space<vmem>>, %arg5: memref<256x256xf32, #tpu.memory_space<vmem>>, %arg6: memref<1x256xf32, #tpu.memory_space<vmem>>, %arg7: memref<256x128xf32, #tpu.memory_space<vmem>>, %arg8: memref<1x128xf32, #tpu.memory_space<vmem>>, %arg9: memref<1x4x128xf32, #tpu.memory_space<vmem>>) attributes {dimension_semantics = [#tpu.dimension_semantics<parallel>, #tpu.dimension_semantics<parallel>, #tpu.dimension_semantics<arbitrary>], iteration_bounds = array<i64: 1, 1, 1>, scalar_prefetch = 1 : i64, scratch_operands = 0 : i64, tpu.core_type = #tpu.core_type<tc>, window_params = [{transform_indices = @transform_0, window_bounds = array<i64: 1, 4, 256>}, {transform_indices = @transform_1, window_bounds = array<i64: 256, 256>}, {transform_indices = @transform_2, window_bounds = array<i64: 1, 256>}, {transform_indices = @transform_3, window_bounds = array<i64: 256, 128>}, {pipeline_mode = #tpu.pipeline_mode<synchronous>, transform_indices = @transform_4, window_bounds = array<i64: 1, 128>}, {transform_indices = @transform_5, window_bounds = array<i64: 1, 4, 128>}]} {
    %c0_i32 = arith.constant 0 : i32
    %0 = arith.cmpi eq, %arg2, %c0_i32 : i32
    %1 = arith.extui %0 : i1 to i32
    %c0_i32_0 = arith.constant 0 : i32
    %2 = arith.cmpi ne, %1, %c0_i32_0 : i32
    scf.if %2 {
      %cst_19 = arith.constant 0.000000e+00 : f32
      %24 = vector.broadcast %cst_19 : f32 to vector<1x4x128xf32>
      %c0_20 = arith.constant 0 : index
      %c0_21 = arith.constant 0 : index
      %c0_22 = arith.constant 0 : index
      %25 = vector.load %arg9[%c0_20, %c0_21, %c0_22] : memref<1x4x128xf32, #tpu.memory_space<vmem>>, vector<1x4x128xf32>
      tpu.vector_store %arg9[%c0_20, %c0_21, %c0_22], %24 {strides = array<i32>} : memref<1x4x128xf32, #tpu.memory_space<vmem>>, vector<1x4x128xf32>,
    } else {
    }
    %c0 = arith.constant 0 : index
    %c0_1 = arith.constant 0 : index
    %c0_2 = arith.constant 0 : index
    %3 = vector.load %arg4[%c0, %c0_1, %c0_2] : memref<1x4x256xf32, #tpu.memory_space<vmem>>, vector<1x4x256xf32>
    %4 = vector.shape_cast %3 : vector<1x4x256xf32> to vector<4x256xf32>
    %c0_3 = arith.constant 0 : index
    %c0_4 = arith.constant 0 : index
    %5 = vector.load %arg5[%c0_3, %c0_4] : memref<256x256xf32, #tpu.memory_space<vmem>>, vector<256x256xf32>
    %cst = arith.constant dense<0.000000e+00> : vector<4x256xf32>
    %6 = tpu.matmul %4, %5, %cst {dimension_numbers = #tpu.dot_dimension_numbers<[1], [0], [0], [1], [0, 0, 1, 1], [], []>} : vector<4x256xf32>, vector<256x256xf32>, vector<4x256xf32> -> vector<4x256xf32>
    %c0_5 = arith.constant 0 : index
    %c0_6 = arith.constant 0 : index
    %7 = vector.load %arg6[%c0_5, %c0_6] : memref<1x256xf32, #tpu.memory_space<vmem>>, vector<1x256xf32>
    %8 = vector.broadcast %7 : vector<1x256xf32> to vector<4x256xf32>
    %9 = arith.addf %6, %8 : vector<4x256xf32>
    %10 = math.tanh %9 : vector<4x256xf32>
    %c0_7 = arith.constant 0 : index
    %c0_8 = arith.constant 0 : index
    %c0_9 = arith.constant 0 : index
    %11 = vector.load %arg9[%c0_7, %c0_8, %c0_9] : memref<1x4x128xf32, #tpu.memory_space<vmem>>, vector<1x4x128xf32>
    %12 = vector.shape_cast %11 : vector<1x4x128xf32> to vector<4x128xf32>
    %c0_10 = arith.constant 0 : index
    %c0_11 = arith.constant 0 : index
    %13 = vector.load %arg7[%c0_10, %c0_11] : memref<256x128xf32, #tpu.memory_space<vmem>>, vector<256x128xf32>
    %cst_12 = arith.constant dense<0.000000e+00> : vector<4x128xf32>
    %14 = tpu.matmul %10, %13, %cst_12 {dimension_numbers = #tpu.dot_dimension_numbers<[1], [0], [0], [1], [0, 0, 1, 1], [], []>} : vector<4x256xf32>, vector<256x128xf32>, vector<4x128xf32> -> vector<4x128xf32>
    %15 = arith.addf %12, %14 : vector<4x128xf32>
    %c0_13 = arith.constant 0 : index
    %c0_14 = arith.constant 0 : index
    %c0_15 = arith.constant 0 : index
    %16 = vector.load %arg9[%c0_13, %c0_14, %c0_15] : memref<1x4x128xf32, #tpu.memory_space<vmem>>, vector<1x4x128xf32>
    %17 = vector.shape_cast %16 : vector<1x4x128xf32> to vector<4x128xf32>
    %18 = vector.shape_cast %15 : vector<4x128xf32> to vector<1x4x128xf32>
    tpu.vector_store %arg9[%c0_13, %c0_14, %c0_15], %18 {strides = array<i32>} : memref<1x4x128xf32, #tpu.memory_space<vmem>>, vector<1x4x128xf32>,
    %c0_i32_16 = arith.constant 0 : i32
    %19 = arith.cmpi eq, %arg2, %c0_i32_16 : i32
    %c0_i32_17 = arith.constant 0 : i32
    %20 = arith.cmpi eq, %arg0, %c0_i32_17 : i32
    %21 = arith.andi %19, %20 : i1
    %22 = arith.extui %21 : i1 to i32
    %c0_i32_18 = arith.constant 0 : i32
    %23 = arith.cmpi ne, %22, %c0_i32_18 : i32
    scf.if %23 {
      %c0_19 = arith.constant 0 : index
      %c0_20 = arith.constant 0 : index
      %c0_21 = arith.constant 0 : index
      %24 = vector.load %arg9[%c0_19, %c0_20, %c0_21] : memref<1x4x128xf32, #tpu.memory_space<vmem>>, vector<1x4x128xf32>
      %25 = vector.shape_cast %24 : vector<1x4x128xf32> to vector<4x128xf32>
      %c0_22 = arith.constant 0 : index
      %c0_23 = arith.constant 0 : index
      %26 = vector.load %arg8[%c0_22, %c0_23] : memref<1x128xf32, #tpu.memory_space<vmem>>, vector<1x128xf32>
      %27 = vector.broadcast %26 : vector<1x128xf32> to vector<4x128xf32>
      %28 = arith.addf %25, %27 : vector<4x128xf32>
      %c0_24 = arith.constant 0 : index
      %c0_25 = arith.constant 0 : index
      %c0_26 = arith.constant 0 : index
      %29 = vector.load %arg9[%c0_24, %c0_25, %c0_26] : memref<1x4x128xf32, #tpu.memory_space<vmem>>, vector<1x4x128xf32>
      %30 = vector.shape_cast %29 : vector<1x4x128xf32> to vector<4x128xf32>
      %31 = vector.shape_cast %28 : vector<4x128xf32> to vector<1x4x128xf32>
      tpu.vector_store %arg9[%c0_24, %c0_25, %c0_26], %31 {strides = array<i32>} : memref<1x4x128xf32, #tpu.memory_space<vmem>>, vector<1x4x128xf32>,
    } else {
    }
    return
  }
  func.func @transform_0(%arg0: i32, %arg1: i32, %arg2: i32, %arg3: memref<1xi32, #tpu.memory_space<smem>>) -> (i32, i32, i32) {
    %0 = arith.index_cast %arg1 : i32 to index
    %1 = memref.load %arg3[%0] : memref<1xi32, #tpu.memory_space<smem>>
    %c0_i32 = arith.constant 0 : i32
    %c0_i32_0 = arith.constant 0 : i32
    %c0_i32_1 = arith.constant 0 : i32
    return %1, %c0_i32, %c0_i32_0 : i32, i32, i32
  }
  func.func @transform_1(%arg0: i32, %arg1: i32, %arg2: i32, %arg3: memref<1xi32, #tpu.memory_space<smem>>) -> (i32, i32) {
    %c1_i32 = arith.constant 1 : i32
    %0 = arith.muli %arg0, %c1_i32 : i32
    %1 = arith.addi %0, %arg2 : i32
    %c0_i32 = arith.constant 0 : i32
    %c0_i32_0 = arith.constant 0 : i32
    return %c0_i32, %1 : i32, i32
  }
  func.func @transform_2(%arg0: i32, %arg1: i32, %arg2: i32, %arg3: memref<1xi32, #tpu.memory_space<smem>>) -> (i32, i32) {
    %c1_i32 = arith.constant 1 : i32
    %0 = arith.muli %arg0, %c1_i32 : i32
    %1 = arith.addi %0, %arg2 : i32
    %c0_i32 = arith.constant 0 : i32
    %c0_i32_0 = arith.constant 0 : i32
    return %c0_i32, %1 : i32, i32
  }
  func.func @transform_3(%arg0: i32, %arg1: i32, %arg2: i32, %arg3: memref<1xi32, #tpu.memory_space<smem>>) -> (i32, i32) {
    %c1_i32 = arith.constant 1 : i32
    %0 = arith.muli %arg0, %c1_i32 : i32
    %1 = arith.addi %0, %arg2 : i32
    %c0_i32 = arith.constant 0 : i32
    %c0_i32_0 = arith.constant 0 : i32
    return %1, %c0_i32 : i32, i32
  }
  func.func @transform_4(%arg0: i32, %arg1: i32, %arg2: i32, %arg3: memref<1xi32, #tpu.memory_space<smem>>) -> (i32, i32) {
    %c0_i32 = arith.constant 0 : i32
    %c0_i32_0 = arith.constant 0 : i32
    %c0_i32_1 = arith.constant 0 : i32
    return %c0_i32, %c0_i32_0 : i32, i32
  }
  func.func @transform_5(%arg0: i32, %arg1: i32, %arg2: i32, %arg3: memref<1xi32, #tpu.memory_space<smem>>) -> (i32, i32, i32) {
    %c1_i32 = arith.constant 1 : i32
    %0 = arith.muli %arg0, %c1_i32 : i32
    %1 = arith.addi %0, %arg1 : i32
    %c0_i32 = arith.constant 0 : i32
    %c0_i32_0 = arith.constant 0 : i32
    %c0_i32_1 = arith.constant 0 : i32
    return %1, %c0_i32, %c0_i32_0 : i32, i32, i32
  }
}

</mosaic_0001>

<bundles_post_ra>
// kernel: tpu_custom_call.1
= control target key start
LH: loop header
LB: loop body
LE: loop exit
PB: predicated region body
PF: predicated region fallthrough
CT: control target
= control target key end

     0   :  { %12 = vsyncpa [#allocation5], 0  ;;  %s749_s0 = inlined_call_operand.<no memory space> [shape: s32[1], index: 0, kind: input, shape index: {}]   ;;  %s750_s1 = inlined_call_operand.hbm [shape: f32[8,4,256], index: 1, kind: input, shape index: {}]   ;;  %s751_s2 = inlined_call_operand.hbm [shape: f32[256,256], index: 2, kind: input, shape index: {}]   ;;  %s752_s3 = inlined_call_operand.vmem [shape: f32[1,256], index: 3, kind: input, shape index: {}]   ;;  %s753_s4 = inlined_call_operand.hbm [shape: f32[256,128], index: 4, kind: input, shape index: {}]   ;;  %s754_s5 = inlined_call_operand.vmem [shape: f32[1,128], index: 5, kind: input, shape index: {}]   ;;  %s755_s6 = inlined_call_operand.hbm [shape: f32[1,4,128], index: 6, kind: output, shape index: {}]  }
   0x1   :  { %13 = vsyncpa [#allocation8], 0 }
   0x2   :  { %14 = vsyncpa [#allocation6], 0  ;;  %s646_s21 = smov [#allocation7]   ;;  %s404_s25 = sshll.u32 %s749_s0, 7 }
   0x3   :  { %s38_s22 = sshll.u32 %s646_s21, 4  ;;  %s550_s28 = scalar_lea.hbm %s751_s2, 8192  ;;  %s39_s22 = int_to_ptr.vmem [resolvable:$true] %s38_s22 }
   0x4   :  { %p551_p0 = scmp.ne.s32.totalorder %s751_s2, %s550_s28  ;;  %p554_p1 = scmp.lt.u32.totalorder %s550_s28, %s751_s2 }
   0x6   :  { %p556_p2 = pnand %p554_p1, %p551_p0 }
   0x8   :  { %559 = shalt.err (!%p556_p2)
}
   0x9   :  { %s560_s9 = scalar_lea.vmem %s39_s22, 8192  ;;  %p565_p4 = scmp.lt.s32.totalorder %s39_s22, %s39_s22 }
   0xa   :  { %p561_p3 = scmp.ne.s32.totalorder %s39_s22, %s560_s9  ;;  %p566_p5 = scmp.lt.s32.totalorder %s560_s9, %s560_s9 }
   0xc   :  { %p567_p6 = por %p566_p5, %p565_p4 }
   0xe   :  { %p568_p7 = pnand %p567_p6, %p561_p3 }
  0x10   :  { %571 = shalt.err (!%p568_p7)
}
  0x11   :  { %s647_s0 = smov 256   ;;  %s648_s10 = smov 16  }
  0x12   :  { %44 = dma.hbm_to_vmem [thread:$0]  %s751_s2, 8192, %s39_s22, [#allocation8], %s647_s0, %s647_s0, %s648_s10  }
  0x13   :  { %s23_s15 = scalar_lea.hbm %s750_s1, %s404_s25  ;;  %s649_s16 = smov [#allocation4]  }
  0x14   :  { %s25_s17 = sshll.u32 %s649_s16, 4  ;;  %s650_s18 = smov [#allocation9]   ;;  %s26_s17 = int_to_ptr.vmem [resolvable:$true] %s25_s17 }
  0x15   :  { %s63_s19 = sshll.u32 %s650_s18, 4  ;;  %s572_s20 = scalar_lea.hbm %s23_s15, 128  ;;  %s64_s19 = int_to_ptr.vmem [resolvable:$true] %s63_s19 }
  0x16   :  { %p573_p8 = scmp.ne.s32.totalorder %s23_s15, %s572_s20  ;;  %s574_s24 = scalar_lea.hbm %s750_s1, 1024 }
  0x17   :  { %p575_p9 = scmp.lt.u32.totalorder %s23_s15, %s750_s1  ;;  %p576_p10 = scmp.lt.u32.totalorder %s574_s24, %s572_s20 }
  0x18   :  { %p578_p12 = scmp.lt.u32.totalorder %s572_s20, %s23_s15 }
  0x19   :  { %p577_p11 = por %p576_p10, %p575_p9 }
  0x1b   :  { %p579_p13 = por %p578_p12, %p577_p11 }
  0x1d   :  { %p580_p0 = pnand %p579_p13, %p573_p8 }
  0x1f   :  { %583 = shalt.err (!%p580_p0)
}
  0x20   :  { %s584_s2 = scalar_lea.vmem %s26_s17, 128  ;;  %p589_p2 = scmp.lt.s32.totalorder %s26_s17, %s26_s17 }
  0x21   :  { %p585_p1 = scmp.ne.s32.totalorder %s26_s17, %s584_s2  ;;  %p590_p3 = scmp.lt.s32.totalorder %s584_s2, %s584_s2 }
  0x23   :  { %p591_p4 = por %p590_p3, %p589_p2 }
  0x25   :  { %p592_p5 = pnand %p591_p4, %p585_p1 }
  0x27   :  { %595 = shalt.err (!%p592_p5)
}
  0x28   :  { %28 = dma.hbm_to_vmem [thread:$0]  %s23_s15, 128, %s26_s17, [#allocation5]  }
  0x29   :  { %s596_s28 = scalar_lea.hbm %s753_s4, 4096 }
  0x2a   :  { %p597_p6 = scmp.ne.s32.totalorder %s753_s4, %s596_s28  ;;  %p600_p7 = scmp.lt.u32.totalorder %s596_s28, %s753_s4 }
  0x2c   :  { %p602_p8 = pnand %p600_p7, %p597_p6 }
  0x2e   :  { %605 = shalt.err (!%p602_p8)
}
  0x2f   :  { %s606_s8 = scalar_lea.vmem %s64_s19, 4096  ;;  %p611_p10 = scmp.lt.s32.totalorder %s64_s19, %s64_s19 }
  0x30   :  { %p607_p9 = scmp.ne.s32.totalorder %s64_s19, %s606_s8  ;;  %p612_p11 = scmp.lt.s32.totalorder %s606_s8, %s606_s8 }
  0x32   :  { %p613_p12 = por %p612_p11, %p611_p10 }
  0x34   :  { %p614_p13 = pnand %p613_p12, %p607_p9 }
  0x36   :  { %617 = shalt.err (!%p614_p13)
}
  0x37   :  { %s651_s9 = smov 128   ;;  %s652_s0 = smov 8  }
  0x38   :  { %69 = dma.hbm_to_vmem [thread:$0]  %s753_s4, 4096, %s64_s19, [#allocation8], %s651_s9, %s651_s9, %s652_s0  }
  0x39   :  { %640 = dma.done.wait [#allocation5], 128  }
  0x3a   :  { %641 = vsyncadd [#allocation5], 4294967168 }
  0x3b   :  { %642 = dma.done.wait [#allocation8], 12288  }
  0x3c   :  { %643 = vsyncadd [#allocation8], 4294955008  ;;  %v106_v0 = vld [vmem:[#allocation7 + $0x8] sm:$0xff]  ;;  %v108_v1 = vld [vmem:[#allocation7 + $0x18] sm:$0xff]  ;;  %s654_s14 = smov [#allocation10]  }
  0x3d   :  { %v105_v2 = vld [vmem:[#allocation7] sm:$0xff]  ;;  %v440_v3 = vpack.c.bf16 %v108_v1, %v106_v0  ;;  %v107_v4 = vld [vmem:[#allocation7 + $0x10] sm:$0xff]  ;;  %v110_v5 = vld [vmem:[#allocation7 + $0x28] sm:$0xff]  ;;  %s386_s15 = sshll.u32 %s654_s14, 4  ;;  %s387_s15 = int_to_ptr.vmem [resolvable:$true] %s386_s15 }
  0x3e   :  { %v112_v6 = vld [vmem:[#allocation7 + $0x38] sm:$0xff]  ;;  %v442_v7 = vpack.c.bf16 %v107_v4, %v105_v2  ;;  %v109_v9 = vld [vmem:[#allocation7 + $0x20] sm:$0xff]  ;;  %v111_v10 = vld [vmem:[#allocation7 + $0x30] sm:$0xff]  ;;  %s618_s16 = scalar_lea.vmem %s387_s15, 64  ;;  %p623_p1 = scmp.lt.s32.totalorder %s387_s15, %s387_s15 }
  0x3f   :  { %v444_v8 = vpack.c.bf16 %v112_v6, %v110_v5  ;;  %v114_v11 = vld [vmem:[#allocation7 + $0x48] sm:$0xff]  ;;  %441 = vmatprep.subr.bf16.mxu0 %v440_v3  ;;  %v116_v12 = vld [vmem:[#allocation7 + $0x58] sm:$0xff]  ;;  %v446_v13 = vpack.c.bf16 %v111_v10, %v109_v9  ;;  %v113_v15 = vld [vmem:[#allocation7 + $0x40] sm:$0xff]  ;;  %p619_p0 = scmp.ne.s32.totalorder %s387_s15, %s618_s16  ;;  %p624_p2 = scmp.lt.s32.totalorder %s618_s16, %s618_s16 }
  0x40   :  { %443 = vmatpush1.bf16.msra.mxu0 %v442_v7  ;;  %v448_v14 = vpack.c.bf16 %v116_v12, %v114_v11  ;;  %v115_v16 = vld [vmem:[#allocation7 + $0x50] sm:$0xff]  ;;  %v118_v17 = vld [vmem:[#allocation7 + $0x68] sm:$0xff]  ;;  %v120_v18 = vld [vmem:[#allocation7 + $0x78] sm:$0xff] }
  0x41   :  { %445 = vmatprep.subr.bf16.mxu0 %v444_v8  ;;  %v450_v19 = vpack.c.bf16 %v115_v16, %v113_v15  ;;  %v452_v20 = vpack.c.bf16 %v120_v18, %v118_v17  ;;  %v117_v21 = vld [vmem:[#allocation7 + $0x60] sm:$0xff]  ;;  %v119_v22 = vld [vmem:[#allocation7 + $0x70] sm:$0xff]  ;;  %v122_v23 = vld [vmem:[#allocation7 + $0x88] sm:$0xff]  ;;  %p625_p3 = por %p624_p2, %p623_p1 }
  0x42   :  { %v124_v24 = vld [vmem:[#allocation7 + $0x98] sm:$0xff]  ;;  %v454_v25 = vpack.c.bf16 %v119_v22, %v117_v21  ;;  %v121_v27 = vld [vmem:[#allocation7 + $0x80] sm:$0xff]  ;;  %v123_v28 = vld [vmem:[#allocation7 + $0x90] sm:$0xff] }
  0x43   :  { %v456_v26 = vpack.c.bf16 %v124_v24, %v122_v23  ;;  %v126_v29 = vld [vmem:[#allocation7 + $0xa8] sm:$0xff]  ;;  %v128_v30 = vld [vmem:[#allocation7 + $0xb8] sm:$0xff]  ;;  %v458_v31 = vpack.c.bf16 %v123_v28, %v121_v27  ;;  %v125_v33 = vld [vmem:[#allocation7 + $0xa0] sm:$0xff]  ;;  %p626_p4 = pnand %p625_p3, %p619_p0 }
  0x44   :  { %447 = vmatpush1.bf16.msra.mxu0 %v446_v13  ;;  %v460_v32 = vpack.c.bf16 %v128_v30, %v126_v29  ;;  %v127_v34 = vld [vmem:[#allocation7 + $0xb0] sm:$0xff]  ;;  %v130_v35 = vld [vmem:[#allocation7 + $0xc8] sm:$0xff]  ;;  %v132_v36 = vld [vmem:[#allocation7 + $0xd8] sm:$0xff] }
  0x45   :  { %449 = vmatprep.subr.bf16.mxu0 %v448_v14  ;;  %v462_v37 = vpack.c.bf16 %v127_v34, %v125_v33  ;;  %v129_v38 = vld [vmem:[#allocation7 + $0xc0] sm:$0xff]  ;;  %v131_v39 = vld [vmem:[#allocation7 + $0xd0] sm:$0xff]  ;;  %v134_v40 = vld [vmem:[#allocation7 + $0xe8] sm:$0xff]  ;;  %v464_v41 = vpack.c.bf16 %v132_v36, %v130_v35 }
  0x46   :  { %v136_v42 = vld [vmem:[#allocation7 + $0xf8] sm:$0xff]  ;;  %v274_v44 = vld [vmem:[#allocation9 + $0x80] sm:$0xff]  ;;  %v275_v46 = vld [vmem:[#allocation9 + $0x88] sm:$0xff]  ;;  %v466_v54 = vpack.c.bf16 %v131_v39, %v129_v38 }
  0x47   :  { %v726_v43 = vld [vmem:[#allocation4] sm:$0xff]  ;;  %v258_v47 = vld [vmem:[#allocation9] sm:$0xff]  ;;  %v259_v48 = vld [vmem:[#allocation9 + $0x8] sm:$0xff]  ;;  %v504_v49 = vpack.c.bf16 %v275_v46, %v274_v44  ;;  %v468_v59 = vpack.c.bf16 %v136_v42, %v134_v40 }
  0x48   :  { %451 = vmatpush1.bf16.msra.mxu0 %v450_v19  ;;  %v182_v45 = vcombine.high %v726_v43, %v726_v43  ;;  %v506_v50 = vpack.c.bf16 %v259_v48, %v258_v47  ;;  %v276_v51 = vld [vmem:[#allocation9 + $0x90] sm:$0xff]  ;;  %v277_v52 = vld [vmem:[#allocation9 + $0x98] sm:$0xff]  ;;  %v278_v57 = vld [vmem:[#allocation9 + $0xa0] sm:$0xff] }
  0x49   :  { %453 = vmatprep.subr.bf16.mxu0 %v452_v20  ;;  %v260_v53 = vld [vmem:[#allocation9 + $0x10] sm:$0xff]  ;;  %v508_v55 = vpack.c.bf16 %v277_v52, %v276_v51  ;;  %v261_v56 = vld [vmem:[#allocation9 + $0x18] sm:$0xff]  ;;  %v279_v58 = vld [vmem:[#allocation9 + $0xa8] sm:$0xff]  ;;  %505 = vmatprep.subr.bf16.mxu1 %v504_v49 }
  0x4a   :  { %248 = vmatprep.mubr.f32.mxu0 %v182_v45  ;;  %v133_v60 = vld [vmem:[#allocation7 + $0xe0] sm:$0xff]  ;;  %v135_v61 = vld [vmem:[#allocation7 + $0xf0] sm:$0xff]  ;;  %v138_v62 = vld [vmem:[#allocation7 + $0x108] sm:$0xff]  ;;  %507 = vmatpush3.bf16.msra.mxu1 %v506_v50  ;;  %v510_v0 = vpack.c.bf16 %v261_v56, %v260_v53  ;;  %v512_v1 = vpack.c.bf16 %v279_v58, %v278_v57 }
  0x4b   :  { %v140_v63 = vld [vmem:[#allocation7 + $0x118] sm:$0xff]  ;;  %509 = vmatprep.subr.bf16.mxu1 %v508_v55  ;;  %v262_v2 = vld [vmem:[#allocation9 + $0x20] sm:$0xff]  ;;  %v263_v3 = vld [vmem:[#allocation9 + $0x28] sm:$0xff]  ;;  %v470_v4 = vpack.c.bf16 %v135_v61, %v133_v60 }
  0x4c   :  { %455 = vmatpush1.bf16.msra.mxu0 %v454_v25  ;;  %v280_v5 = vld [vmem:[#allocation9 + $0xb0] sm:$0xff]  ;;  %v281_v6 = vld [vmem:[#allocation9 + $0xb8] sm:$0xff]  ;;  %v472_v7 = vpack.c.bf16 %v140_v63, %v138_v62  ;;  %v137_v8 = vld [vmem:[#allocation7 + $0x100] sm:$0xff]  ;;  %v514_v12 = vpack.c.bf16 %v263_v3, %v262_v2 }
  0x4d   :  { %457 = vmatprep.subr.bf16.mxu0 %v456_v26  ;;  %v139_v9 = vld [vmem:[#allocation7 + $0x110] sm:$0xff]  ;;  %v142_v10 = vld [vmem:[#allocation7 + $0x128] sm:$0xff]  ;;  %v144_v11 = vld [vmem:[#allocation7 + $0x138] sm:$0xff]  ;;  %v516_v13 = vpack.c.bf16 %v281_v6, %v280_v5 }
  0x4e   :  { %511 = vmatpush3.bf16.msra.mxu1 %v510_v0  ;;  %v264_v14 = vld [vmem:[#allocation9 + $0x30] sm:$0xff]  ;;  %v265_v15 = vld [vmem:[#allocation9 + $0x38] sm:$0xff]  ;;  %v474_v16 = vpack.c.bf16 %v139_v9, %v137_v8  ;;  %v476_v17 = vpack.c.bf16 %v144_v11, %v142_v10  ;;  %v141_v18 = vld [vmem:[#allocation7 + $0x120] sm:$0xff] }
  0x4f   :  { %513 = vmatprep.subr.bf16.mxu1 %v512_v1  ;;  %v143_v19 = vld [vmem:[#allocation7 + $0x130] sm:$0xff]  ;;  %v146_v20 = vld [vmem:[#allocation7 + $0x148] sm:$0xff]  ;;  %v148_v21 = vld [vmem:[#allocation7 + $0x158] sm:$0xff]  ;;  %v518_v22 = vpack.c.bf16 %v265_v15, %v264_v14 }
  0x50   :  { %459 = vmatpush1.bf16.msra.mxu0 %v458_v31  ;;  %v478_v23 = vpack.c.bf16 %v143_v19, %v141_v18  ;;  %v480_v24 = vpack.c.bf16 %v148_v21, %v146_v20  ;;  %v145_v25 = vld [vmem:[#allocation7 + $0x140] sm:$0xff]  ;;  %v147_v26 = vld [vmem:[#allocation7 + $0x150] sm:$0xff]  ;;  %v150_v27 = vld [vmem:[#allocation7 + $0x168] sm:$0xff]  ;;  %v171_v18 = vlaneseq }
  0x51   :  { %461 = vmatprep.subr.bf16.mxu0 %v460_v32  ;;  %v152_v28 = vld [vmem:[#allocation7 + $0x178] sm:$0xff]  ;;  %v482_v29 = vpack.c.bf16 %v147_v26, %v145_v25  ;;  %v149_v31 = vld [vmem:[#allocation7 + $0x160] sm:$0xff]  ;;  %v151_v32 = vld [vmem:[#allocation7 + $0x170] sm:$0xff] }
  0x52   :  { %515 = vmatpush3.bf16.msra.mxu1 %v514_v12  ;;  %v484_v30 = vpack.c.bf16 %v152_v28, %v150_v27  ;;  %v154_v33 = vld [vmem:[#allocation7 + $0x188] sm:$0xff]  ;;  %v156_v34 = vld [vmem:[#allocation7 + $0x198] sm:$0xff]  ;;  %v486_v35 = vpack.c.bf16 %v151_v32, %v149_v31  ;;  %v155_v38 = vld [vmem:[#allocation7 + $0x190] sm:$0xff]  ;;  %v172_v19 = vshrl.u32 %v171_v18, 7  ;;  %v653_v31 = vmov 0.0  }
  0x53   :  { %517 = vmatprep.subr.bf16.mxu1 %v516_v13  ;;  %v488_v36 = vpack.c.bf16 %v156_v34, %v154_v33  ;;  %v158_v39 = vld [vmem:[#allocation7 + $0x1a8] sm:$0xff]  ;;  %v160_v40 = vld [vmem:[#allocation7 + $0x1b8] sm:$0xff]  ;;  %v157_v44 = vld [vmem:[#allocation7 + $0x1a0] sm:$0xff]  ;;  %103 = vst [vmem:[#allocation10] sm:$0xf] %v653_v31 }
  0x54   :  { %463 = vmatpush1.bf16.msra.mxu0 %v462_v37  ;;  %v153_v37 = vld [vmem:[#allocation7 + $0x180] sm:$0xff]  ;;  %v492_v42 = vpack.c.bf16 %v160_v40, %v158_v39  ;;  %v159_v45 = vld [vmem:[#allocation7 + $0x1b0] sm:$0xff]  ;;  %v162_v46 = vld [vmem:[#allocation7 + $0x1c8] sm:$0xff]  ;;  %v173_v20 = vsub.s32 0, %v172_v19 }
  0x55   :  { %465 = vmatprep.subr.bf16.mxu0 %v464_v41  ;;  %v490_v41 = vpack.c.bf16 %v155_v38, %v153_v37  ;;  %v164_v47 = vld [vmem:[#allocation7 + $0x1d8] sm:$0xff]  ;;  %v494_v48 = vpack.c.bf16 %v159_v45, %v157_v44  ;;  %v161_v50 = vld [vmem:[#allocation7 + $0x1c0] sm:$0xff]  ;;  %v163_v51 = vld [vmem:[#allocation7 + $0x1d0] sm:$0xff] }
  0x56   :  { %519 = vmatpush3.bf16.msra.mxu1 %v518_v22  ;;  %v496_v49 = vpack.c.bf16 %v164_v47, %v162_v46  ;;  %v166_v52 = vld [vmem:[#allocation7 + $0x1e8] sm:$0xff]  ;;  %v168_v53 = vld [vmem:[#allocation7 + $0x1f8] sm:$0xff]  ;;  %v165_v56 = vld [vmem:[#allocation7 + $0x1e0] sm:$0xff]  ;;  %v177_v22 = vsub.s32 1, %v172_v19 }
  0x57   :  { %v500_v55 = vpack.c.bf16 %v168_v53, %v166_v52  ;;  %v167_v57 = vld [vmem:[#allocation7 + $0x1f0] sm:$0xff]  ;;  %v283_v60 = vld [vmem:[#allocation9 + $0xc8] sm:$0xff]  ;;  %v266_v62 = vld [vmem:[#allocation9 + $0x40] sm:$0xff] }
  0x58   :  { %467 = vmatpush1.bf16.msra.mxu0 %v466_v54  ;;  %v498_v54 = vpack.c.bf16 %v163_v51, %v161_v50  ;;  %v502_v58 = vpack.c.bf16 %v167_v57, %v165_v56  ;;  %v267_v63 = vld [vmem:[#allocation9 + $0x48] sm:$0xff]  ;;  %v284_v1 = vld [vmem:[#allocation9 + $0xd0] sm:$0xff]  ;;  %v285_v2 = vld [vmem:[#allocation9 + $0xd8] sm:$0xff] }
  0x59   :  { %469 = vmatprep.subr.bf16.mxu0 %v468_v59  ;;  %v282_v59 = vld [vmem:[#allocation9 + $0xc0] sm:$0xff]  ;;  %v522_v0 = vpack.c.bf16 %v267_v63, %v266_v62  ;;  %v524_v3 = vpack.c.bf16 %v285_v2, %v284_v1  ;;  %v269_v5 = vld [vmem:[#allocation9 + $0x58] sm:$0xff]  ;;  %v287_v8 = vld [vmem:[#allocation9 + $0xe8] sm:$0xff] }
  0x5a   :  { %v520_v61 = vpack.c.bf16 %v283_v60, %v282_v59  ;;  %v270_v9 = vld [vmem:[#allocation9 + $0x60] sm:$0xff]  ;;  %v271_v10 = vld [vmem:[#allocation9 + $0x68] sm:$0xff]  ;;  %v288_v11 = vld [vmem:[#allocation9 + $0xf0] sm:$0xff] }
  0x5b   :  { %v289_v12 = vld [vmem:[#allocation9 + $0xf8] sm:$0xff]  ;;  %v530_v13 = vpack.c.bf16 %v271_v10, %v270_v9  ;;  %v272_v15 = vld [vmem:[#allocation9 + $0x70] sm:$0xff]  ;;  %v257_v33 = vld [vmem:[#allocation10] sm:$0xf] }
  0x5c   :  { %471 = vmatpush1.bf16.msra.mxu0 %v470_v4  ;;  %521 = vmatprep.subr.bf16.mxu1 %v520_v61  ;;  %v268_v4 = vld [vmem:[#allocation9 + $0x50] sm:$0xff]  ;;  %v532_v14 = vpack.c.bf16 %v289_v12, %v288_v11  ;;  %v169_v21 = vld [vmem:[%s752_s3] sm:$0x3] }
  0x5d   :  { %473 = vmatprep.subr.bf16.mxu0 %v472_v7  ;;  %523 = vmatpush3.bf16.msra.mxu1 %v522_v0  ;;  %v526_v6 = vpack.c.bf16 %v269_v5, %v268_v4  ;;  %v286_v7 = vld [vmem:[#allocation9 + $0xe0] sm:$0xff]  ;;  %v403_v37 = vld [vmem:[%s754_s5] ss:$0 sm:$0xff] }
  0x5e   :  { %525 = vmatprep.subr.bf16.mxu1 %v524_v3 }
  0x60   :  { %475 = vmatpush1.bf16.msra.mxu0 %v474_v16  ;;  %v273_v16 = vld [vmem:[#allocation9 + $0x78] sm:$0xff] }
  0x61   :  { %477 = vmatprep.subr.bf16.mxu0 %v476_v17  ;;  %527 = vmatpush3.bf16.msra.mxu1 %v526_v6  ;;  %v534_v17 = vpack.c.bf16 %v273_v16, %v272_v15 }
  0x64   :  { %479 = vmatpush1.bf16.msra.mxu0 %v478_v23  ;;  %v174_v23 = vrot.slane %v169_v21, %v173_v20 }
  0x65   :  { %481 = vmatprep.subr.bf16.mxu0 %v480_v24  ;;  %v178_v24 = vrot.slane %v169_v21, %v177_v22 }
  0x68   :  { %483 = vmatpush1.bf16.msra.mxu0 %v482_v29 }
  0x69   :  { %485 = vmatprep.subr.bf16.mxu0 %v484_v30 }
  0x6c   :  { %487 = vmatpush1.bf16.msra.mxu0 %v486_v35 }
  0x6d   :  { %489 = vmatprep.subr.bf16.mxu0 %v488_v36 }
  0x70   :  { %491 = vmatpush1.bf16.msra.mxu0 %v490_v41 }
  0x71   :  { %493 = vmatprep.subr.bf16.mxu0 %v492_v42 }
  0x74   :  { %495 = vmatpush1.bf16.msra.mxu0 %v494_v48 }
  0x75   :  { %497 = vmatprep.subr.bf16.mxu0 %v496_v49 }
  0x78   :  { %499 = vmatpush1.bf16.msra.mxu0 %v498_v54 }
  0x79   :  { %501 = vmatprep.subr.bf16.mxu0 %v500_v55 }
  0x7c   :  { %503 = vmatpush1.bf16.msra.mxu0 %v502_v58 }
  0x7f   :  { %249 = vmatmul.mubr.f32.vlgmr.msra.gmra.mrb[0].mxu0 %v726_v43  ;;  %v528_v43 = vpack.c.bf16 %v287_v8, %v286_v7 }
  0x81   :  { %529 = vmatprep.subr.bf16.mxu1 %v528_v43 }
  0x82   :  { %531 = vmatpush3.bf16.msra.mxu1 %v530_v13 }
  0x83   :  { %533 = vmatprep.subr.bf16.mxu1 %v532_v14 }
  0x86   :  { %535 = vmatpush3.bf16.msra.mxu1 %v534_v17 }
 0x152   :  { %v250_v25 = vpop.f32.mrb[0].mxu0 }
 0x153   :  { %v251_v26 = vadd.f32 %v250_v25, %v174_v23  ;;  %v252_v27 = vpop.f32.mrb[1].mxu0 }
 0x154   :  { %v253_v28 = vadd.f32 %v252_v27, %v178_v24 }
 0x156   :  { %546 = vtanh.f32 %v253_v28 }
 0x157   :  { %548 = vtanh.f32 %v251_v26 }
 0x160   :  { %v547_v29 = vpop.eup %546 }
 0x161   :  { %v549_v30 = vpop.eup %548  ;;  %354 = vmatprep.mubr.f32.mxu1 %v547_v29 }
 0x162   :  { %355 = vmatmul.mubr.f32.vlgmr.msra.gmra.mrb[0].mxu1 %v549_v30 }
 0x235   :  { %v437_v32 = vpop.f32.mrb[0].mxu1 }
 0x236   :  { %v438_v34 = vpop.f32.mrb[1].mxu1 }
 0x237   :  { %v439_v35 = vadd.f32 %v438_v34, %v437_v32 }
 0x239   :  { %v360_v36 = vadd.f32 %v439_v35, %v257_v33 }
 0x23b   :  { %361 = vst [vmem:[#allocation10] sm:$0xf] %v360_v36 }
 0x242   :  { %v367_v38 = vld [vmem:[#allocation10] sm:$0xf] }
 0x243   :  { %v375_v39 = vadd.f32 %v403_v37, %v367_v38 }
 0x245   :  { %376 = vst [vmem:[#allocation10] sm:$0xf] %v375_v39 }
 0x246   :  { %629 = shalt.err (!%p626_p4)
}
 0x247   :  { %s630_s19 = scalar_lea.hbm %s755_s6, 64 }
 0x248   :  { %p631_p5 = scmp.ne.s32.totalorder %s755_s6, %s630_s19  ;;  %p634_p6 = scmp.lt.u32.totalorder %s630_s19, %s755_s6 }
 0x24a   :  { %p636_p7 = pnand %p634_p6, %p631_p5 }
 0x24c   :  { %639 = shalt.err (!%p636_p7)
}
 0x24d   :  { %389 = dma.vmem_to_hbm [thread:$0]  %s387_s15, 64, %s755_s6, [#allocation6]  }
 0x24e   :  { %644 = dma.done.wait [#allocation6], 64  }
 0x24f   :  { %645 = vsyncadd [#allocation6], 4294967232 }
 0x250   :  { %393 = vsyncpa [#allocation5], 1 }
 0x251   :  { %394 = vsyncpa [#allocation8], 1 }
 0x252   :  { %395 = vsyncpa [#allocation6], 1 }

</bundles_post_ra>
